<compile_context>
chip_gen: v7x
topology: tpu7x:2x2x1
jax: 0.10.0
libtpu: 0.0.40
codegen_flags: <defaults>
</compile_context>

<pallas_src>
import math
from functools import partial

import jax
import jax.numpy as jnp
from jax.experimental import pallas as pl
from jax.experimental.pallas import tpu as pltpu

# Flip to jnp.bfloat16 on v6e/v7x at scaled-up shapes to halve HBM/VMEM traffic
# feeding the MXU (accumulation stays f32 via preferred_element_type; LayerNorm
# and softmax epilogues stay f32 so v5e's f32-only VPU/EUP path is unaffected).
MXU_DTYPE = jnp.float32


def _mxu(a):
    return a.astype(MXU_DTYPE)


_VMEM = pl.BlockSpec(memory_space=pltpu.MemorySpace.VMEM)


# --------------------------- fused encoder layer ----------------------------

def _make_encoder_layer_kernel(S, D, H, d_fc):
    dh = D // H
    scale = 1.0 / math.sqrt(dh)

    def kernel(x_ref, wqkv_ref, bqkv_ref, wo_ref, bo_ref,
               ln1g_ref, ln1b_ref, w1_ref, b1_ref, w2_ref, b2_ref,
               ln2g_ref, ln2b_ref, o_ref, attn_scr):
        x = x_ref[0]                                               # (S, D)

        # ---- fused QKV projection: one (S,D)@(D,3D) MXU pass ----
        qkv = (jnp.dot(_mxu(x), _mxu(wqkv_ref[...]),
                       preferred_element_type=jnp.float32) + bqkv_ref[...])

        # ---- multi-head self-attention; heads sliced on the lane axis ----
        # TODO(synk): key_padding_mask / attention masking not applied (mask is
        # None in this synthetic run).
        for h in range(H):
            qh = qkv[:, h * dh:(h + 1) * dh]                       # (S, dh)
            kh = qkv[:, D + h * dh:D + (h + 1) * dh]
            vh = qkv[:, 2 * D + h * dh:2 * D + (h + 1) * dh]
            # contract over dh without materializing kh.T
            s = jax.lax.dot_general(
                _mxu(qh), _mxu(kh), (((1,), (1,)), ((), ())),
                preferred_element_type=jnp.float32) * scale        # (S, S)
            m = jnp.max(s, axis=-1, keepdims=True)
            p = jnp.exp(s - m)
            p = p * pl.reciprocal(jnp.sum(p, axis=-1, keepdims=True),
                                  approx=True)
            attn_scr[:, pl.ds(h * dh, dh)] = jnp.dot(
                _mxu(p), _mxu(vh), preferred_element_type=jnp.float32)

        # ---- output projection + residual + LayerNorm1 ----
        proj = (jnp.dot(_mxu(attn_scr[...]), _mxu(wo_ref[...]),
                        preferred_element_type=jnp.float32) + bo_ref[...])
        y = proj + x
        mu = jnp.mean(y, axis=-1, keepdims=True)
        var = jnp.mean((y - mu) ** 2, axis=-1, keepdims=True)
        x1 = (y - mu) * jax.lax.rsqrt(var + 1e-5) * ln1g_ref[...] + ln1b_ref[...]

        # ---- FFN (w1 + bias + ReLU, w2 + bias) + residual + LayerNorm2 ----
        hdn = jnp.maximum(
            jnp.dot(_mxu(x1), _mxu(w1_ref[...]),
                    preferred_element_type=jnp.float32) + b1_ref[...], 0.0)
        y2 = (jnp.dot(_mxu(hdn), _mxu(w2_ref[...]),
                      preferred_element_type=jnp.float32) + b2_ref[...]) + x1
        mu2 = jnp.mean(y2, axis=-1, keepdims=True)
        var2 = jnp.mean((y2 - mu2) ** 2, axis=-1, keepdims=True)
        o_ref[0] = ((y2 - mu2) * jax.lax.rsqrt(var2 + 1e-5) * ln2g_ref[...]
                    + ln2b_ref[...])

    return kernel


def encoder_layer(x, p, n_heads):
    B, S, D = x.shape
    d_fc = p["w1"].shape[1]

    def wspec(r, c):
        return pl.BlockSpec((r, c), lambda b: (0, 0))   # resident across grid

    return pl.pallas_call(
        _make_encoder_layer_kernel(S, D, n_heads, d_fc),
        out_shape=jax.ShapeDtypeStruct((B, S, D), jnp.float32),
        grid=(B,),
        in_specs=[
            pl.BlockSpec((1, S, D), lambda b: (b, 0, 0)),   # x
            wspec(D, 3 * D), wspec(1, 3 * D),               # wqkv, bqkv
            wspec(D, D), wspec(1, D),                       # wo, bo
            wspec(1, D), wspec(1, D),                       # ln1 gamma, beta
            wspec(D, d_fc), wspec(1, d_fc),                 # w1, b1
            wspec(d_fc, D), wspec(1, D),                    # w2, b2
            wspec(1, D), wspec(1, D),                       # ln2 gamma, beta
        ],
        out_specs=pl.BlockSpec((1, S, D), lambda b: (b, 0, 0)),
        scratch_shapes=[pltpu.VMEM((S, D), jnp.float32)],
        compiler_params=pltpu.CompilerParams(
            dimension_semantics=("parallel",)),  # splits across 2 TCs on v7x
    )(x, p["wqkv"], p["bqkv"], p["wo"], p["bo"],
      p["ln1_g"], p["ln1_b"], p["w1"], p["b1"], p["w2"], p["b2"],
      p["ln2_g"], p["ln2_b"])


# ------------------------------ MLM head ------------------------------------

def _mlm_head_kernel(x_ref, w_ref, b_ref, o_ref):
    o_ref[...] = (jnp.dot(_mxu(x_ref[...]), _mxu(w_ref[...]),
                          preferred_element_type=jnp.float32) + b_ref[...])


def mlm_head(x2d, w_pad, b_pad):
    M = x2d.shape[0]
    Npad = w_pad.shape[1]                       # padded to a multiple of 128
    return pl.pallas_call(
        _mlm_head_kernel,
        out_shape=jax.ShapeDtypeStruct((M, Npad), jnp.float32),
        in_specs=[_VMEM, _VMEM, _VMEM],
        out_specs=_VMEM,
    )(x2d, w_pad, b_pad)


# ------------------------------ model ----------------------------------------

def sinusoidal_pos_embedding(max_len, d_model):
    pos = jnp.arange(max_len, dtype=jnp.float32)[:, None]
    i = jnp.arange(d_model, dtype=jnp.float32)[None, :]
    angle = pos / jnp.power(10000.0, (2.0 * jnp.floor(i / 2.0)) / d_model)
    pe = jnp.where((jnp.arange(d_model) % 2) == 0, jnp.sin(angle), jnp.cos(angle))
    return pe  # (max_len, d_model)


def _round_up(n, m):
    return ((n + m - 1) // m) * m


def init_params(key, max_len, mlm_cls_num, doc_cls_num, d_model, d_fc,
                n_heads, n_layers):
    ks = jax.random.split(key, 3 + n_layers)
    mlm_pad = _round_up(mlm_cls_num, 128)       # lane-dense MLM head output
    mlm_w = 0.02 * jax.random.normal(ks[1], (d_model, mlm_cls_num), jnp.float32)
    params = {
        "token_emb": 0.02 * jax.random.normal(ks[0], (mlm_cls_num, d_model),
                                              jnp.float32),
        "pos_emb": sinusoidal_pos_embedding(max_len, d_model),
        "mlm_w_pad": jnp.pad(mlm_w, ((0, 0), (0, mlm_pad - mlm_cls_num))),
        "mlm_b_pad": jnp.zeros((1, mlm_pad), jnp.float32),
        "cls_w": 0.02 * jax.random.normal(ks[2], (d_model, doc_cls_num),
                                          jnp.float32),
        "cls_b": jnp.zeros((doc_cls_num,), jnp.float32),
        "layers": [],
    }
    for l in range(n_layers):
        lk = jax.random.split(ks[3 + l], 6)
        wq = 0.02 * jax.random.normal(lk[0], (d_model, d_model), jnp.float32)
        wk = 0.02 * jax.random.normal(lk[1], (d_model, d_model), jnp.float32)
        wv = 0.02 * jax.random.normal(lk[2], (d_model, d_model), jnp.float32)
        layer = {
            # pre-fused QKV weight/bias -> one (D, 3D) matmul per layer
            "wqkv": jnp.concatenate([wq, wk, wv], axis=1),
            "bqkv": jnp.zeros((1, 3 * d_model), jnp.float32),
            "wo": 0.02 * jax.random.normal(lk[3], (d_model, d_model), jnp.float32),
            "bo": jnp.zeros((1, d_model), jnp.float32),
            "w1": 0.02 * jax.random.normal(lk[4], (d_model, d_fc), jnp.float32),
            "b1": jnp.zeros((1, d_fc), jnp.float32),
            "w2": 0.02 * jax.random.normal(lk[5], (d_fc, d_model), jnp.float32),
            "b2": jnp.zeros((1, d_model), jnp.float32),
            "ln1_g": jnp.ones((1, d_model), jnp.float32),
            "ln1_b": jnp.zeros((1, d_model), jnp.float32),
            "ln2_g": jnp.ones((1, d_model), jnp.float32),
            "ln2_b": jnp.zeros((1, d_model), jnp.float32),
        }
        params["layers"].append(layer)
    return params


@partial(jax.jit, static_argnums=(2, 3))
def my_model_forward(params, x_ids, n_heads, mlm_cls_num, key_padding_mask=None):
    # TODO(synk): key_padding_mask handling (None in this synthetic run) — not applied.
    B, S = x_ids.shape
    D = params["token_emb"].shape[1]
    x = jnp.take(params["token_emb"], x_ids, axis=0)           # (B, S, D) glue
    x = x + params["pos_emb"][:S][None, :, :]                  # positional glue
    for layer_params in params["layers"]:
        x = encoder_layer(x, layer_params, n_heads)            # 1 pallas_call / layer
    # MLM head: lane-dense (padded to 128) Pallas matmul, slice back afterwards
    logits_pad = mlm_head(x.reshape(B * S, D),
                          params["mlm_w_pad"], params["mlm_b_pad"])
    yp_mlm = logits_pad.reshape(B, S, -1)[:, :, :mlm_cls_num]
    # CLS head: (B, D) @ (D, doc_cls_num) is too small for a kernel -> plain dot
    yp_cls = jnp.dot(x[:, 0, :], params["cls_w"]) + params["cls_b"]
    return yp_mlm, yp_cls


# ------------------------------ main ------------------------------------------

if __name__ == "__main__":
    max_len = 16
    mlm_cls_num = 50
    doc_cls_num = 3
    d_model = 32
    d_fc = 64
    n_heads = 4
    n_layers = 2
    B, S = 2, 8

    key = jax.random.PRNGKey(0)
    pkey, xkey = jax.random.split(key)
    params = init_params(pkey, max_len, mlm_cls_num, doc_cls_num,
                         d_model, d_fc, n_heads, n_layers)
    x_ids = jax.random.randint(xkey, (B, S), 0, mlm_cls_num, dtype=jnp.int32)

    yp_mlm, yp_cls = my_model_forward(params, x_ids, n_heads, mlm_cls_num)
    jax.block_until_ready(yp_mlm)
    jax.block_until_ready(yp_cls)
    assert yp_mlm.shape == (B, S, mlm_cls_num)
    assert yp_cls.shape == (B, doc_cls_num)
    print("KERNEL_OK")
</pallas_src>

<mosaic_0001>
module attributes {stable_mosaic.version = 11 : i64} {
  func.func @_mlm_head_kernel(%arg0: memref<16x32xf32, #tpu.memory_space<vmem>>, %arg1: memref<32x128xf32, #tpu.memory_space<vmem>>, %arg2: memref<1x128xf32, #tpu.memory_space<vmem>>, %arg3: memref<16x128xf32, #tpu.memory_space<vmem>>) attributes {dimension_semantics = [], scalar_prefetch = 0 : i64, scratch_operands = 0 : i64, tpu.core_type = #tpu.core_type<tc>} {
    %c0 = arith.constant 0 : index
    %c0_0 = arith.constant 0 : index
    %0 = vector.load %arg0[%c0, %c0_0] : memref<16x32xf32, #tpu.memory_space<vmem>>, vector<16x32xf32>
    %c0_1 = arith.constant 0 : index
    %c0_2 = arith.constant 0 : index
    %1 = vector.load %arg1[%c0_1, %c0_2] : memref<32x128xf32, #tpu.memory_space<vmem>>, vector<32x128xf32>
    %cst = arith.constant dense<0.000000e+00> : vector<16x128xf32>
    %2 = tpu.matmul %0, %1, %cst {dimension_numbers = #tpu.dot_dimension_numbers<[1], [0], [0], [1], [0, 0, 1, 1], [], []>} : vector<16x32xf32>, vector<32x128xf32>, vector<16x128xf32> -> vector<16x128xf32>
    %c0_3 = arith.constant 0 : index
    %c0_4 = arith.constant 0 : index
    %3 = vector.load %arg2[%c0_3, %c0_4] : memref<1x128xf32, #tpu.memory_space<vmem>>, vector<1x128xf32>
    %4 = vector.broadcast %3 : vector<1x128xf32> to vector<16x128xf32>
    %5 = arith.addf %2, %4 : vector<16x128xf32>
    %c0_5 = arith.constant 0 : index
    %c0_6 = arith.constant 0 : index
    %6 = vector.load %arg3[%c0_5, %c0_6] : memref<16x128xf32, #tpu.memory_space<vmem>>, vector<16x128xf32>
    tpu.vector_store %arg3[%c0_5, %c0_6], %5 {strides = array<i32>} : memref<16x128xf32, #tpu.memory_space<vmem>>, vector<16x128xf32>,
    return
  }
}

module attributes {stable_mosaic.version = 11 : i64} {
  func.func @kernel(%arg0: i32, %arg1: memref<1x8x32xf32, #tpu.memory_space<vmem>>, %arg2: memref<32x96xf32, #tpu.memory_space<vmem>>, %arg3: memref<1x96xf32, #tpu.memory_space<vmem>>, %arg4: memref<32x32xf32, #tpu.memory_space<vmem>>, %arg5: memref<1x32xf32, #tpu.memory_space<vmem>>, %arg6: memref<1x32xf32, #tpu.memory_space<vmem>>, %arg7: memref<1x32xf32, #tpu.memory_space<vmem>>, %arg8: memref<32x64xf32, #tpu.memory_space<vmem>>, %arg9: memref<1x64xf32, #tpu.memory_space<vmem>>, %arg10: memref<64x32xf32, #tpu.memory_space<vmem>>, %arg11: memref<1x32xf32, #tpu.memory_space<vmem>>, %arg12: memref<1x32xf32, #tpu.memory_space<vmem>>, %arg13: memref<1x32xf32, #tpu.memory_space<vmem>>, %arg14: memref<1x8x32xf32, #tpu.memory_space<vmem>>, %arg15: memref<8x32xf32, #tpu.memory_space<vmem>>) attributes {dimension_semantics = [#tpu.dimension_semantics<parallel>], iteration_bounds = array<i64: 2>, scalar_prefetch = 0 : i64, scratch_operands = 1 : i64, tpu.core_type = #tpu.core_type<tc>, window_params = [{transform_indices = @transform_0, window_bounds = array<i64: 1, 8, 32>}, {pipeline_mode = #tpu.pipeline_mode<synchronous>, transform_indices = @transform_1, window_bounds = array<i64: 32, 96>}, {pipeline_mode = #tpu.pipeline_mode<synchronous>, transform_indices = @transform_2, window_bounds = array<i64: 1, 96>}, {pipeline_mode = #tpu.pipeline_mode<synchronous>, transform_indices = @transform_3, window_bounds = array<i64: 32, 32>}, {pipeline_mode = #tpu.pipeline_mode<synchronous>, transform_indices = @transform_4, window_bounds = array<i64: 1, 32>}, {pipeline_mode = #tpu.pipeline_mode<synchronous>, transform_indices = @transform_5, window_bounds = array<i64: 1, 32>}, {pipeline_mode = #tpu.pipeline_mode<synchronous>, transform_indices = @transform_6, window_bounds = array<i64: 1, 32>}, {pipeline_mode = #tpu.pipeline_mode<synchronous>, transform_indices = @transform_7, window_bounds = array<i64: 32, 64>}, {pipeline_mode = #tpu.pipeline_mode<synchronous>, transform_indices = @transform_8, window_bounds = array<i64: 1, 64>}, {pipeline_mode = #tpu.pipeline_mode<synchronous>, transform_indices = @transform_9, window_bounds = array<i64: 64, 32>}, {pipeline_mode = #tpu.pipeline_mode<synchronous>, transform_indices = @transform_10, window_bounds = array<i64: 1, 32>}, {pipeline_mode = #tpu.pipeline_mode<synchronous>, transform_indices = @transform_11, window_bounds = array<i64: 1, 32>}, {pipeline_mode = #tpu.pipeline_mode<synchronous>, transform_indices = @transform_12, window_bounds = array<i64: 1, 32>}, {transform_indices = @transform_13, window_bounds = array<i64: 1, 8, 32>}]} {
    %c0 = arith.constant 0 : index
    %c0_0 = arith.constant 0 : index
    %c0_1 = arith.constant 0 : index
    %0 = vector.load %arg1[%c0, %c0_0, %c0_1] : memref<1x8x32xf32, #tpu.memory_space<vmem>>, vector<1x8x32xf32>
    %1 = vector.shape_cast %0 : vector<1x8x32xf32> to vector<8x32xf32>
    %c0_2 = arith.constant 0 : index
    %c0_3 = arith.constant 0 : index
    %2 = vector.load %arg2[%c0_2, %c0_3] : memref<32x96xf32, #tpu.memory_space<vmem>>, vector<32x96xf32>
    %cst = arith.constant dense<0.000000e+00> : vector<8x96xf32>
    %3 = tpu.matmul %1, %2, %cst {dimension_numbers = #tpu.dot_dimension_numbers<[1], [0], [0], [1], [0, 0, 1, 1], [], []>} : vector<8x32xf32>, vector<32x96xf32>, vector<8x96xf32> -> vector<8x96xf32>
    %c0_4 = arith.constant 0 : index
    %c0_5 = arith.constant 0 : index
    %4 = vector.load %arg3[%c0_4, %c0_5] : memref<1x96xf32, #tpu.memory_space<vmem>>, vector<1x96xf32>
    %5 = vector.broadcast %4 : vector<1x96xf32> to vector<8x96xf32>
    %6 = arith.addf %3, %5 : vector<8x96xf32>
    %7 = vector.extract_strided_slice %6 {offsets = [0, 0], sizes = [8, 8], strides = [1, 1]} : vector<8x96xf32> to vector<8x8xf32>
    %8 = vector.extract_strided_slice %6 {offsets = [0, 32], sizes = [8, 8], strides = [1, 1]} : vector<8x96xf32> to vector<8x8xf32>
    %9 = vector.extract_strided_slice %6 {offsets = [0, 64], sizes = [8, 8], strides = [1, 1]} : vector<8x96xf32> to vector<8x8xf32>
    %cst_6 = arith.constant dense<0.000000e+00> : vector<8x8xf32>
    %10 = tpu.matmul %7, %8, %cst_6 {dimension_numbers = #tpu.dot_dimension_numbers<[1], [1], [0], [0], [0, 0, 1, 0], [], []>} : vector<8x8xf32>, vector<8x8xf32>, vector<8x8xf32> -> vector<8x8xf32>
    %cst_7 = arith.constant 0.353553385 : f32
    %11 = vector.broadcast %cst_7 : f32 to vector<8x8xf32>
    %12 = arith.mulf %10, %11 : vector<8x8xf32>
    %cst_8 = arith.constant dense<0xFF800000> : vector<8xf32>
    %13 = vector.multi_reduction <maximumf>, %12, %cst_8 [1] : vector<8x8xf32> to vector<8xf32>
    %14 = vector.shape_cast %13 : vector<8xf32> to vector<8x1xf32>
    %15 = vector.broadcast %14 : vector<8x1xf32> to vector<8x8xf32>
    %16 = arith.subf %12, %15 : vector<8x8xf32>
    %17 = math.exp %16 : vector<8x8xf32>
    %cst_9 = arith.constant dense<0.000000e+00> : vector<8xf32>
    %18 = vector.multi_reduction <add>, %17, %cst_9 [1] : vector<8x8xf32> to vector<8xf32>
    %19 = vector.shape_cast %18 : vector<8xf32> to vector<8x1xf32>
    %20 = tpu.reciprocal %19 {approx = true} : vector<8x1xf32> -> vector<8x1xf32>
    %21 = vector.broadcast %20 : vector<8x1xf32> to vector<8x8xf32>
    %22 = arith.mulf %17, %21 : vector<8x8xf32>
    %cst_10 = arith.constant dense<0.000000e+00> : vector<8x8xf32>
    %23 = tpu.matmul %22, %9, %cst_10 {dimension_numbers = #tpu.dot_dimension_numbers<[1], [0], [0], [1], [0, 0, 1, 1], [], []>} : vector<8x8xf32>, vector<8x8xf32>, vector<8x8xf32> -> vector<8x8xf32>
    %c0_11 = arith.constant 0 : index
    %c0_12 = arith.constant 0 : index
    %24 = vector.load %arg15[%c0_11, %c0_12] : memref<8x32xf32, #tpu.memory_space<vmem>>, vector<8x8xf32>
    tpu.vector_store %arg15[%c0_11, %c0_12], %23 {strides = array<i32>} : memref<8x32xf32, #tpu.memory_space<vmem>>, vector<8x8xf32>,
    %25 = vector.extract_strided_slice %6 {offsets = [0, 8], sizes = [8, 8], strides = [1, 1]} : vector<8x96xf32> to vector<8x8xf32>
    %26 = vector.extract_strided_slice %6 {offsets = [0, 40], sizes = [8, 8], strides = [1, 1]} : vector<8x96xf32> to vector<8x8xf32>
    %27 = vector.extract_strided_slice %6 {offsets = [0, 72], sizes = [8, 8], strides = [1, 1]} : vector<8x96xf32> to vector<8x8xf32>
    %cst_13 = arith.constant dense<0.000000e+00> : vector<8x8xf32>
    %28 = tpu.matmul %25, %26, %cst_13 {dimension_numbers = #tpu.dot_dimension_numbers<[1], [1], [0], [0], [0, 0, 1, 0], [], []>} : vector<8x8xf32>, vector<8x8xf32>, vector<8x8xf32> -> vector<8x8xf32>
    %cst_14 = arith.constant 0.353553385 : f32
    %29 = vector.broadcast %cst_14 : f32 to vector<8x8xf32>
    %30 = arith.mulf %28, %29 : vector<8x8xf32>
    %cst_15 = arith.constant dense<0xFF800000> : vector<8xf32>
    %31 = vector.multi_reduction <maximumf>, %30, %cst_15 [1] : vector<8x8xf32> to vector<8xf32>
    %32 = vector.shape_cast %31 : vector<8xf32> to vector<8x1xf32>
    %33 = vector.broadcast %32 : vector<8x1xf32> to vector<8x8xf32>
    %34 = arith.subf %30, %33 : vector<8x8xf32>
    %35 = math.exp %34 : vector<8x8xf32>
    %cst_16 = arith.constant dense<0.000000e+00> : vector<8xf32>
    %36 = vector.multi_reduction <add>, %35, %cst_16 [1] : vector<8x8xf32> to vector<8xf32>
    %37 = vector.shape_cast %36 : vector<8xf32> to vector<8x1xf32>
    %38 = tpu.reciprocal %37 {approx = true} : vector<8x1xf32> -> vector<8x1xf32>
    %39 = vector.broadcast %38 : vector<8x1xf32> to vector<8x8xf32>
    %40 = arith.mulf %35, %39 : vector<8x8xf32>
    %cst_17 = arith.constant dense<0.000000e+00> : vector<8x8xf32>
    %41 = tpu.matmul %40, %27, %cst_17 {dimension_numbers = #tpu.dot_dimension_numbers<[1], [0], [0], [1], [0, 0, 1, 1], [], []>} : vector<8x8xf32>, vector<8x8xf32>, vector<8x8xf32> -> vector<8x8xf32>
    %c0_18 = arith.constant 0 : index
    %c8 = arith.constant 8 : index
    %42 = vector.load %arg15[%c0_18, %c8] : memref<8x32xf32, #tpu.memory_space<vmem>>, vector<8x8xf32>
    tpu.vector_store %arg15[%c0_18, %c8], %41 {strides = array<i32>} : memref<8x32xf32, #tpu.memory_space<vmem>>, vector<8x8xf32>,
    %43 = vector.extract_strided_slice %6 {offsets = [0, 16], sizes = [8, 8], strides = [1, 1]} : vector<8x96xf32> to vector<8x8xf32>
    %44 = vector.extract_strided_slice %6 {offsets = [0, 48], sizes = [8, 8], strides = [1, 1]} : vector<8x96xf32> to vector<8x8xf32>
    %45 = vector.extract_strided_slice %6 {offsets = [0, 80], sizes = [8, 8], strides = [1, 1]} : vector<8x96xf32> to vector<8x8xf32>
    %cst_19 = arith.constant dense<0.000000e+00> : vector<8x8xf32>
    %46 = tpu.matmul %43, %44, %cst_19 {dimension_numbers = #tpu.dot_dimension_numbers<[1], [1], [0], [0], [0, 0, 1, 0], [], []>} : vector<8x8xf32>, vector<8x8xf32>, vector<8x8xf32> -> vector<8x8xf32>
    %cst_20 = arith.constant 0.353553385 : f32
    %47 = vector.broadcast %cst_20 : f32 to vector<8x8xf32>
    %48 = arith.mulf %46, %47 : vector<8x8xf32>
    %cst_21 = arith.constant dense<0xFF800000> : vector<8xf32>
    %49 = vector.multi_reduction <maximumf>, %48, %cst_21 [1] : vector<8x8xf32> to vector<8xf32>
    %50 = vector.shape_cast %49 : vector<8xf32> to vector<8x1xf32>
    %51 = vector.broadcast %50 : vector<8x1xf32> to vector<8x8xf32>
    %52 = arith.subf %48, %51 : vector<8x8xf32>
    %53 = math.exp %52 : vector<8x8xf32>
    %cst_22 = arith.constant dense<0.000000e+00> : vector<8xf32>
    %54 = vector.multi_reduction <add>, %53, %cst_22 [1] : vector<8x8xf32> to vector<8xf32>
    %55 = vector.shape_cast %54 : vector<8xf32> to vector<8x1xf32>
    %56 = tpu.reciprocal %55 {approx = true} : vector<8x1xf32> -> vector<8x1xf32>
    %57 = vector.broadcast %56 : vector<8x1xf32> to vector<8x8xf32>
    %58 = arith.mulf %53, %57 : vector<8x8xf32>
    %cst_23 = arith.constant dense<0.000000e+00> : vector<8x8xf32>
    %59 = tpu.matmul %58, %45, %cst_23 {dimension_numbers = #tpu.dot_dimension_numbers<[1], [0], [0], [1], [0, 0, 1, 1], [], []>} : vector<8x8xf32>, vector<8x8xf32>, vector<8x8xf32> -> vector<8x8xf32>
    %c0_24 = arith.constant 0 : index
    %c16 = arith.constant 16 : index
    %60 = vector.load %arg15[%c0_24, %c16] : memref<8x32xf32, #tpu.memory_space<vmem>>, vector<8x8xf32>
    tpu.vector_store %arg15[%c0_24, %c16], %59 {strides = array<i32>} : memref<8x32xf32, #tpu.memory_space<vmem>>, vector<8x8xf32>,
    %61 = vector.extract_strided_slice %6 {offsets = [0, 24], sizes = [8, 8], strides = [1, 1]} : vector<8x96xf32> to vector<8x8xf32>
    %62 = vector.extract_strided_slice %6 {offsets = [0, 56], sizes = [8, 8], strides = [1, 1]} : vector<8x96xf32> to vector<8x8xf32>
    %63 = vector.extract_strided_slice %6 {offsets = [0, 88], sizes = [8, 8], strides = [1, 1]} : vector<8x96xf32> to vector<8x8xf32>
    %cst_25 = arith.constant dense<0.000000e+00> : vector<8x8xf32>
    %64 = tpu.matmul %61, %62, %cst_25 {dimension_numbers = #tpu.dot_dimension_numbers<[1], [1], [0], [0], [0, 0, 1, 0], [], []>} : vector<8x8xf32>, vector<8x8xf32>, vector<8x8xf32> -> vector<8x8xf32>
    %cst_26 = arith.constant 0.353553385 : f32
    %65 = vector.broadcast %cst_26 : f32 to vector<8x8xf32>
    %66 = arith.mulf %64, %65 : vector<8x8xf32>
    %cst_27 = arith.constant dense<0xFF800000> : vector<8xf32>
    %67 = vector.multi_reduction <maximumf>, %66, %cst_27 [1] : vector<8x8xf32> to vector<8xf32>
    %68 = vector.shape_cast %67 : vector<8xf32> to vector<8x1xf32>
    %69 = vector.broadcast %68 : vector<8x1xf32> to vector<8x8xf32>
    %70 = arith.subf %66, %69 : vector<8x8xf32>
    %71 = math.exp %70 : vector<8x8xf32>
    %cst_28 = arith.constant dense<0.000000e+00> : vector<8xf32>
    %72 = vector.multi_reduction <add>, %71, %cst_28 [1] : vector<8x8xf32> to vector<8xf32>
    %73 = vector.shape_cast %72 : vector<8xf32> to vector<8x1xf32>
    %74 = tpu.reciprocal %73 {approx = true} : vector<8x1xf32> -> vector<8x1xf32>
    %75 = vector.broadcast %74 : vector<8x1xf32> to vector<8x8xf32>
    %76 = arith.mulf %71, %75 : vector<8x8xf32>
    %cst_29 = arith.constant dense<0.000000e+00> : vector<8x8xf32>
    %77 = tpu.matmul %76, %63, %cst_29 {dimension_numbers = #tpu.dot_dimension_numbers<[1], [0], [0], [1], [0, 0, 1, 1], [], []>} : vector<8x8xf32>, vector<8x8xf32>, vector<8x8xf32> -> vector<8x8xf32>
    %c0_30 = arith.constant 0 : index
    %c24 = arith.constant 24 : index
    %78 = vector.load %arg15[%c0_30, %c24] : memref<8x32xf32, #tpu.memory_space<vmem>>, vector<8x8xf32>
    tpu.vector_store %arg15[%c0_30, %c24], %77 {strides = array<i32>} : memref<8x32xf32, #tpu.memory_space<vmem>>, vector<8x8xf32>,
    %c0_31 = arith.constant 0 : index
    %c0_32 = arith.constant 0 : index
    %79 = vector.load %arg15[%c0_31, %c0_32] : memref<8x32xf32, #tpu.memory_space<vmem>>, vector<8x32xf32>
    %c0_33 = arith.constant 0 : index
    %c0_34 = arith.constant 0 : index
    %80 = vector.load %arg4[%c0_33, %c0_34] : memref<32x32xf32, #tpu.memory_space<vmem>>, vector<32x32xf32>
    %cst_35 = arith.constant dense<0.000000e+00> : vector<8x32xf32>
    %81 = tpu.matmul %79, %80, %cst_35 {dimension_numbers = #tpu.dot_dimension_numbers<[1], [0], [0], [1], [0, 0, 1, 1], [], []>} : vector<8x32xf32>, vector<32x32xf32>, vector<8x32xf32> -> vector<8x32xf32>
    %c0_36 = arith.constant 0 : index
    %c0_37 = arith.constant 0 : index
    %82 = vector.load %arg5[%c0_36, %c0_37] : memref<1x32xf32, #tpu.memory_space<vmem>>, vector<1x32xf32>
    %83 = vector.broadcast %82 : vector<1x32xf32> to vector<8x32xf32>
    %84 = arith.addf %81, %83 : vector<8x32xf32>
    %85 = arith.addf %84, %1 : vector<8x32xf32>
    %cst_38 = arith.constant dense<0.000000e+00> : vector<8xf32>
    %86 = vector.multi_reduction <add>, %85, %cst_38 [1] : vector<8x32xf32> to vector<8xf32>
    %87 = vector.shape_cast %86 : vector<8xf32> to vector<8x1xf32>
    %cst_39 = arith.constant 3.200000e+01 : f32
    %88 = vector.broadcast %cst_39 : f32 to vector<8x1xf32>
    %89 = arith.divf %87, %88 : vector<8x1xf32>
    %90 = vector.broadcast %89 : vector<8x1xf32> to vector<8x32xf32>
    %91 = arith.subf %85, %90 : vector<8x32xf32>
    %92 = arith.mulf %91, %91 : vector<8x32xf32>
    %cst_40 = arith.constant dense<0.000000e+00> : vector<8xf32>
    %93 = vector.multi_reduction <add>, %92, %cst_40 [1] : vector<8x32xf32> to vector<8xf32>
    %94 = vector.shape_cast %93 : vector<8xf32> to vector<8x1xf32>
    %cst_41 = arith.constant 3.200000e+01 : f32
    %95 = vector.broadcast %cst_41 : f32 to vector<8x1xf32>
    %96 = arith.divf %94, %95 : vector<8x1xf32>
    %97 = vector.broadcast %89 : vector<8x1xf32> to vector<8x32xf32>
    %98 = arith.subf %85, %97 : vector<8x32xf32>
    %cst_42 = arith.constant 9.99999974E-6 : f32
    %99 = vector.broadcast %cst_42 : f32 to vector<8x1xf32>
    %100 = arith.addf %96, %99 : vector<8x1xf32>
    %101 = math.rsqrt %100 : vector<8x1xf32>
    %102 = vector.broadcast %101 : vector<8x1xf32> to vector<8x32xf32>
    %103 = arith.mulf %98, %102 : vector<8x32xf32>
    %c0_43 = arith.constant 0 : index
    %c0_44 = arith.constant 0 : index
    %104 = vector.load %arg6[%c0_43, %c0_44] : memref<1x32xf32, #tpu.memory_space<vmem>>, vector<1x32xf32>
    %105 = vector.broadcast %104 : vector<1x32xf32> to vector<8x32xf32>
    %106 = arith.mulf %103, %105 : vector<8x32xf32>
    %c0_45 = arith.constant 0 : index
    %c0_46 = arith.constant 0 : index
    %107 = vector.load %arg7[%c0_45, %c0_46] : memref<1x32xf32, #tpu.memory_space<vmem>>, vector<1x32xf32>
    %108 = vector.broadcast %107 : vector<1x32xf32> to vector<8x32xf32>
    %109 = arith.addf %106, %108 : vector<8x32xf32>
    %c0_47 = arith.constant 0 : index
    %c0_48 = arith.constant 0 : index
    %110 = vector.load %arg8[%c0_47, %c0_48] : memref<32x64xf32, #tpu.memory_space<vmem>>, vector<32x64xf32>
    %cst_49 = arith.constant dense<0.000000e+00> : vector<8x64xf32>
    %111 = tpu.matmul %109, %110, %cst_49 {dimension_numbers = #tpu.dot_dimension_numbers<[1], [0], [0], [1], [0, 0, 1, 1], [], []>} : vector<8x32xf32>, vector<32x64xf32>, vector<8x64xf32> -> vector<8x64xf32>
    %c0_50 = arith.constant 0 : index
    %c0_51 = arith.constant 0 : index
    %112 = vector.load %arg9[%c0_50, %c0_51] : memref<1x64xf32, #tpu.memory_space<vmem>>, vector<1x64xf32>
    %113 = vector.broadcast %112 : vector<1x64xf32> to vector<8x64xf32>
    %114 = arith.addf %111, %113 : vector<8x64xf32>
    %cst_52 = arith.constant 0.000000e+00 : f32
    %115 = vector.broadcast %cst_52 : f32 to vector<8x64xf32>
    %116 = arith.maximumf %114, %115 : vector<8x64xf32>
    %c0_53 = arith.constant 0 : index
    %c0_54 = arith.constant 0 : index
    %117 = vector.load %arg10[%c0_53, %c0_54] : memref<64x32xf32, #tpu.memory_space<vmem>>, vector<64x32xf32>
    %cst_55 = arith.constant dense<0.000000e+00> : vector<8x32xf32>
    %118 = tpu.matmul %116, %117, %cst_55 {dimension_numbers = #tpu.dot_dimension_numbers<[1], [0], [0], [1], [0, 0, 1, 1], [], []>} : vector<8x64xf32>, vector<64x32xf32>, vector<8x32xf32> -> vector<8x32xf32>
    %c0_56 = arith.constant 0 : index
    %c0_57 = arith.constant 0 : index
    %119 = vector.load %arg11[%c0_56, %c0_57] : memref<1x32xf32, #tpu.memory_space<vmem>>, vector<1x32xf32>
    %120 = vector.broadcast %119 : vector<1x32xf32> to vector<8x32xf32>
    %121 = arith.addf %118, %120 : vector<8x32xf32>
    %122 = arith.addf %121, %109 : vector<8x32xf32>
    %cst_58 = arith.constant dense<0.000000e+00> : vector<8xf32>
    %123 = vector.multi_reduction <add>, %122, %cst_58 [1] : vector<8x32xf32> to vector<8xf32>
    %124 = vector.shape_cast %123 : vector<8xf32> to vector<8x1xf32>
    %cst_59 = arith.constant 3.200000e+01 : f32
    %125 = vector.broadcast %cst_59 : f32 to vector<8x1xf32>
    %126 = arith.divf %124, %125 : vector<8x1xf32>
    %127 = vector.broadcast %126 : vector<8x1xf32> to vector<8x32xf32>
    %128 = arith.subf %122, %127 : vector<8x32xf32>
    %129 = arith.mulf %128, %128 : vector<8x32xf32>
    %cst_60 = arith.constant dense<0.000000e+00> : vector<8xf32>
    %130 = vector.multi_reduction <add>, %129, %cst_60 [1] : vector<8x32xf32> to vector<8xf32>
    %131 = vector.shape_cast %130 : vector<8xf32> to vector<8x1xf32>
    %cst_61 = arith.constant 3.200000e+01 : f32
    %132 = vector.broadcast %cst_61 : f32 to vector<8x1xf32>
    %133 = arith.divf %131, %132 : vector<8x1xf32>
    %134 = vector.broadcast %126 : vector<8x1xf32> to vector<8x32xf32>
    %135 = arith.subf %122, %134 : vector<8x32xf32>
    %cst_62 = arith.constant 9.99999974E-6 : f32
    %136 = vector.broadcast %cst_62 : f32 to vector<8x1xf32>
    %137 = arith.addf %133, %136 : vector<8x1xf32>
    %138 = math.rsqrt %137 : vector<8x1xf32>
    %139 = vector.broadcast %138 : vector<8x1xf32> to vector<8x32xf32>
    %140 = arith.mulf %135, %139 : vector<8x32xf32>
    %c0_63 = arith.constant 0 : index
    %c0_64 = arith.constant 0 : index
    %141 = vector.load %arg12[%c0_63, %c0_64] : memref<1x32xf32, #tpu.memory_space<vmem>>, vector<1x32xf32>
    %142 = vector.broadcast %141 : vector<1x32xf32> to vector<8x32xf32>
    %143 = arith.mulf %140, %142 : vector<8x32xf32>
    %c0_65 = arith.constant 0 : index
    %c0_66 = arith.constant 0 : index
    %144 = vector.load %arg13[%c0_65, %c0_66] : memref<1x32xf32, #tpu.memory_space<vmem>>, vector<1x32xf32>
    %145 = vector.broadcast %144 : vector<1x32xf32> to vector<8x32xf32>
    %146 = arith.addf %143, %145 : vector<8x32xf32>
    %c0_67 = arith.constant 0 : index
    %c0_68 = arith.constant 0 : index
    %c0_69 = arith.constant 0 : index
    %147 = vector.load %arg14[%c0_67, %c0_68, %c0_69] : memref<1x8x32xf32, #tpu.memory_space<vmem>>, vector<1x8x32xf32>
    %148 = vector.shape_cast %147 : vector<1x8x32xf32> to vector<8x32xf32>
    %149 = vector.shape_cast %146 : vector<8x32xf32> to vector<1x8x32xf32>
    tpu.vector_store %arg14[%c0_67, %c0_68, %c0_69], %149 {strides = array<i32>} : memref<1x8x32xf32, #tpu.memory_space<vmem>>, vector<1x8x32xf32>,
    return
  }
  func.func @transform_0(%arg0: i32) -> (i32, i32, i32) {
    %c0_i32 = arith.constant 0 : i32
    %c0_i32_0 = arith.constant 0 : i32
    %c0_i32_1 = arith.constant 0 : i32
    return %arg0, %c0_i32, %c0_i32_0 : i32, i32, i32
  }
  func.func @transform_1(%arg0: i32) -> (i32, i32) {
    %c0_i32 = arith.constant 0 : i32
    %c0_i32_0 = arith.constant 0 : i32
    %c0_i32_1 = arith.constant 0 : i32
    return %c0_i32, %c0_i32_0 : i32, i32
  }
  func.func @transform_2(%arg0: i32) -> (i32, i32) {
    %c0_i32 = arith.constant 0 : i32
    %c0_i32_0 = arith.constant 0 : i32
    %c0_i32_1 = arith.constant 0 : i32
    return %c0_i32, %c0_i32_0 : i32, i32
  }
  func.func @transform_3(%arg0: i32) -> (i32, i32) {
    %c0_i32 = arith.constant 0 : i32
    %c0_i32_0 = arith.constant 0 : i32
    %c0_i32_1 = arith.constant 0 : i32
    return %c0_i32, %c0_i32_0 : i32, i32
  }
  func.func @transform_4(%arg0: i32) -> (i32, i32) {
    %c0_i32 = arith.constant 0 : i32
    %c0_i32_0 = arith.constant 0 : i32
    %c0_i32_1 = arith.constant 0 : i32
    return %c0_i32, %c0_i32_0 : i32, i32
  }
  func.func @transform_5(%arg0: i32) -> (i32, i32) {
    %c0_i32 = arith.constant 0 : i32
    %c0_i32_0 = arith.constant 0 : i32
    %c0_i32_1 = arith.constant 0 : i32
    return %c0_i32, %c0_i32_0 : i32, i32
  }
  func.func @transform_6(%arg0: i32) -> (i32, i32) {
    %c0_i32 = arith.constant 0 : i32
    %c0_i32_0 = arith.constant 0 : i32
    %c0_i32_1 = arith.constant 0 : i32
    return %c0_i32, %c0_i32_0 : i32, i32
  }
  func.func @transform_7(%arg0: i32) -> (i32, i32) {
    %c0_i32 = arith.constant 0 : i32
    %c0_i32_0 = arith.constant 0 : i32
    %c0_i32_1 = arith.constant 0 : i32
    return %c0_i32, %c0_i32_0 : i32, i32
  }
  func.func @transform_8(%arg0: i32) -> (i32, i32) {
    %c0_i32 = arith.constant 0 : i32
    %c0_i32_0 = arith.constant 0 : i32
    %c0_i32_1 = arith.constant 0 : i32
    return %c0_i32, %c0_i32_0 : i32, i32
  }
  func.func @transform_9(%arg0: i32) -> (i32, i32) {
    %c0_i32 = arith.constant 0 : i32
    %c0_i32_0 = arith.constant 0 : i32
    %c0_i32_1 = arith.constant 0 : i32
    return %c0_i32, %c0_i32_0 : i32, i32
  }
  func.func @transform_10(%arg0: i32) -> (i32, i32) {
    %c0_i32 = arith.constant 0 : i32
    %c0_i32_0 = arith.constant 0 : i32
    %c0_i32_1 = arith.constant 0 : i32
    return %c0_i32, %c0_i32_0 : i32, i32
  }
  func.func @transform_11(%arg0: i32) -> (i32, i32) {
    %c0_i32 = arith.constant 0 : i32
    %c0_i32_0 = arith.constant 0 : i32
    %c0_i32_1 = arith.constant 0 : i32
    return %c0_i32, %c0_i32_0 : i32, i32
  }
  func.func @transform_12(%arg0: i32) -> (i32, i32) {
    %c0_i32 = arith.constant 0 : i32
    %c0_i32_0 = arith.constant 0 : i32
    %c0_i32_1 = arith.constant 0 : i32
    return %c0_i32, %c0_i32_0 : i32, i32
  }
  func.func @transform_13(%arg0: i32) -> (i32, i32, i32) {
    %c0_i32 = arith.constant 0 : i32
    %c0_i32_0 = arith.constant 0 : i32
    %c0_i32_1 = arith.constant 0 : i32
    return %arg0, %c0_i32, %c0_i32_0 : i32, i32, i32
  }
}

</mosaic_0001>

<bundles_post_ra>
// kernel: my_model_forward.5
= control target key start
LH: loop header
LB: loop body
LE: loop exit
PB: predicated region body
PF: predicated region fallthrough
CT: control target
= control target key end

     0   :  { %vm28_vm0 = vcmask 261120   ;;  %s239_s0 = inlined_call_operand.vmem [shape: f32[16,32], index: 0, kind: input, shape index: {}]   ;;  %s240_s1 = inlined_call_operand.vmem [shape: f32[32,128], index: 1, kind: input, shape index: {}]   ;;  %s241_s2 = inlined_call_operand.vmem [shape: f32[1,128], index: 2, kind: input, shape index: {}]   ;;  %s242_s3 = inlined_call_operand.hbm [shape: f32[16,128], index: 3, kind: output, shape index: {}]  }
   0x1   :  { %v17_v0 = vld [vmem:[%s240_s1] sm:$0xff]  ;;  %v18_v1 = vld [vmem:[%s240_s1 + $0x8] sm:$0xff]  ;;  %v19_v2 = vld [vmem:[%s240_s1 + $0x10] sm:$0xff] }
   0x2   :  { %v148_v3 = vpack.c.bf16 %v18_v1, %v17_v0  ;;  %v20_v4 = vld [vmem:[%s240_s1 + $0x18] sm:$0xff]  ;;  %v15_v5 = vld [vmem:[%s239_s0] sm:$0xff] }
   0x3   :  { %v152_v6 = vpack.c.bf16 %v20_v4, %v19_v2  ;;  %145 = vmatprep.mubr.msk.f32.mxu0 %vm28_vm0, %v15_v5 }
   0x4   :  { %8 = vsyncpa [#allocation3], 0  ;;  %149 = vmatprep.subr.bf16.mxu0 %v148_v3  ;;  %v16_v7 = vld [vmem:[%s239_s0 + $0x8] sm:$0xff]  ;;  %v128_v8 = vld [vmem:[%s241_s2] ss:$0 sm:$0xff]  ;;  %s183_s1 = smov [#allocation2]  }
   0x5   :  { %151 = vmatpush3.bf16.msra.mxu0 %v148_v3  ;;  %s117_s26 = sshll.u32 %s183_s1, 4  ;;  %s118_s26 = int_to_ptr.vmem [resolvable:$true] %s117_s26 }
   0x6   :  { %153 = vmatprep.subr.bf16.mxu0 %v152_v6  ;;  %s159_s27 = scalar_lea.vmem %s118_s26, 256  ;;  %p164_p1 = scmp.lt.s32.totalorder %s118_s26, %s118_s26 }
   0x7   :  { %p160_p0 = scmp.ne.s32.totalorder %s118_s26, %s159_s27  ;;  %p165_p2 = scmp.lt.s32.totalorder %s159_s27, %s159_s27 }
   0x9   :  { %155 = vmatpush3.bf16.msra.mxu0 %v152_v6  ;;  %p166_p3 = por %p165_p2, %p164_p1 }
   0xb   :  { %p167_p4 = pnand %p166_p3, %p160_p0 }
   0xc   :  { %146 = vmatmul.mubr.msk.f32.vlgmr.msra.gmra.mrb[0].mxu0 %vm28_vm0, %v16_v7 }
  0xdf   :  { %v147_v9 = vpop.f32.mrb[0].mxu0 }
  0xe0   :  { %v107_v10 = vadd.f32 %v147_v9, %v128_v8  ;;  %v101_v11 = vpop.f32.mrb[1].mxu0 }
  0xe1   :  { %v102_v12 = vadd.f32 %v128_v8, %v101_v11 }
  0xe2   :  { %111 = vst [vmem:[#allocation2 + $0x8] sm:$0xff] %v107_v10 }
  0xe3   :  { %110 = vst [vmem:[#allocation2] sm:$0xff] %v102_v12 }
  0xe4   :  { %170 = shalt.err (!%p167_p4)
}
  0xe5   :  { %s171_s2 = scalar_lea.hbm %s242_s3, 256 }
  0xe6   :  { %p172_p5 = scmp.ne.s32.totalorder %s242_s3, %s171_s2  ;;  %p175_p6 = scmp.lt.u32.totalorder %s171_s2, %s242_s3 }
  0xe8   :  { %p177_p7 = pnand %p175_p6, %p172_p5 }
  0xea   :  { %180 = shalt.err (!%p177_p7)
}
  0xeb   :  { %s184_s6 = smov 128   ;;  %s185_s7 = smov 8  }
  0xec   :  { %123 = dma.vmem_to_hbm [thread:$0]  %s118_s26, 256, %s242_s3, [#allocation3], %s184_s6, %s184_s6, %s185_s7  }
  0xed   :  { %181 = dma.done.wait [#allocation3], 256  }
  0xee   :  { %182 = vsyncadd [#allocation3], 4294967040 }
  0xef   :  { %127 = vsyncpa [#allocation3], 1 }

// kernel: my_model_forward.3
= control target key start
LH: loop header
LB: loop body
LE: loop exit
PB: predicated region body
PF: predicated region fallthrough
CT: control target
= control target key end

     0   :  { %s1914_s25 = smov 0   ;;  %s2111_s0 = inlined_call_operand.vmem [shape: f32[2,8,32], index: 0, kind: input, shape index: {}]   ;;  %s2112_s1 = inlined_call_operand.vmem [shape: f32[32,96], index: 1, kind: input, shape index: {}]   ;;  %s2113_s2 = inlined_call_operand.vmem [shape: f32[1,96], index: 2, kind: input, shape index: {}]   ;;  %s2114_s3 = inlined_call_operand.vmem [shape: f32[32,32], index: 3, kind: input, shape index: {}]   ;;  %s2115_s4 = inlined_call_operand.vmem [shape: f32[1,32], index: 4, kind: input, shape index: {}]   ;;  %s2116_s5 = inlined_call_operand.vmem [shape: f32[1,32], index: 5, kind: input, shape index: {}]   ;;  %s2117_s6 = inlined_call_operand.vmem [shape: f32[1,32], index: 6, kind: input, shape index: {}]   ;;  %s2118_s7 = inlined_call_operand.vmem [shape: f32[32,64], index: 7, kind: input, shape index: {}]   ;;  %s2119_s8 = inlined_call_operand.vmem [shape: f32[1,64], index: 8, kind: input, shape index: {}]   ;;  %s2120_s9 = inlined_call_operand.vmem [shape: f32[64,32], index: 9, kind: input, shape index: {}]   ;;  %s2121_s10 = inlined_call_operand.vmem [shape: f32[1,32], index: 10, kind: input, shape index: {}]   ;;  %s2122_s11 = inlined_call_operand.vmem [shape: f32[1,32], index: 11, kind: input, shape index: {}]   ;;  %s2123_s12 = inlined_call_operand.vmem [shape: f32[1,32], index: 12, kind: input, shape index: {}]   ;;  %s2124_s13 = inlined_call_operand.vmem [shape: f32[2,8,32], index: 13, kind: output, shape index: {}]  }
   0x1 LB: > { %s1579_s26 = sadd.s32 4294967295, %s1825_s25   ;;  %p1583_p0 = scmp.ge.s32.totalorder %s1825_s25, 1  ;;  %s1825_s25 = sphi %s1914_s25, %s23_s25  }
   0x2   : > { %p386_p1 = scmp.lt.s32.totalorder %s1825_s25, 3 }
   0x4   : > { %p387_p2 = pnand %p1583_p0, %p386_p1 }
   0x5   : > { %v437_v0 = vld [vmem:[%s2112_s1] sm:$0xff] (!%p387_p2)  ;;  %v438_v1 = vld [vmem:[%s2112_s1 + $0x8] sm:$0xff] (!%p387_p2)  ;;  %v439_v2 = vld [vmem:[%s2112_s1 + $0x10] sm:$0xff] (!%p387_p2)  ;;  %v1827_v3 = vmov (!%p387_p2), 0.0|0.0   ;;  %vm1828_vm0 = vmmov (!%p387_p2), 0   ;;  %v1829_v6 = vmov (!%p387_p2), 0.0  }
   0x6   : > { %390 = sbr.rel (%p387_p2) target bundleno = 2544 (0x9f0), region = 72  ;;  %1744 = vmatprep.subr.bf16.mxu1 (!%p387_p2), %v1827_v3  ;;  %v1745_v4 = vpack.c.bf16 (!%p387_p2), %v438_v1, %v437_v0  ;;  %v440_v5 = vld [vmem:[%s2112_s1 + $0x18] sm:$0xff] (!%p387_p2)  ;;  %1660 = vmatprep.mubr.msk.f32.mxu1 (!%p387_p2), %vm1828_vm0, %v1829_v6  ;;  %p428_p3 = scmp.lt.s32.totalorder (!%p387_p2), %s1579_s26, 1  ;;  %vm448_vm1 = vcmask (!%p387_p2), 261120   ;;  %v1586_v9 = vld [vmem:[%s2113_s2] ss:$0 sm:$0xff] (!%p387_p2) }
   0x7   : > { %1673 = vmatprep.subr.mxu0 (!%p387_p2), %v1829_v6  ;;  %1675 = vmatprep.mubr.msk.f32.mxu0 (!%p387_p2), %vm1828_vm0, %v1829_v6  ;;  %v1748_v7 = vpack.c.bf16 (!%p387_p2), %v440_v5, %v439_v2  ;;  %s1830_s24 = smov (!%p387_p2), 120   ;;  %s1831_s27 = smov (!%p387_p2), 96   ;;  %vm525_vm2 = vcmask (!%p387_p2), 64512   ;;  %vm859_vm3 = vcmask (!%p387_p2), 130112   ;;  %vm1031_vm4 = vcmask (!%p387_p2), 195712  }
   0x8   : > { %1746 = vmatpush3.bf16.msra.mxu1 (!%p387_p2), %v1745_v4  ;;  %s1832_s28 = smov (!%p387_p2), 80   ;;  %s1833_s29 = smov (!%p387_p2), 88   ;;  %vm1203_vm5 = vcmask (!%p387_p2), 261312   ;;  %vm1421_vm6 = vcmask (!%p387_p2), 523264  }
   0x9   : > { %1747 = vmatprep.subr.bf16.mxu1 (!%p387_p2), %v1827_v3  ;;  %s1834_s30 = smov (!%p387_p2), 72   ;;  %s1835_s14 = smov (!%p387_p2), 112  }
   0xa   : > { %s1836_s15 = smov (!%p387_p2), 104   ;;  %s1837_s16 = smov (!%p387_p2), 56  }
   0xb   : > { %s1838_s17 = smov (!%p387_p2), 64   ;;  %s1839_s19 = smov (!%p387_p2), 48  }
   0xc   : > { %1749 = vmatpush3.bf16.msra.mxu1 (!%p387_p2), %v1748_v7  ;;  %s1840_s20 = smov (!%p387_p2), 40  }
   0xd   : > { %s2126_s26 = smov (!%p428_p3, %s1579_s26), 1  ;;  %1663 = vmatprep.subr.mxu1 %v1829_v6 }
   0xe   : > { %s1584_s18 = sshll.u32 %s2126_s26, 3 }
   0xf   : > { %s431_s21 = scalar_lea.vmem %s2111_s0, %s1584_s18 }
  0x10   : > { %v1949_v8 = vld [vmem:[%s431_s21] sm:$0xff]  ;;  %s1841_s21 = smov 8  }
  0x11   : > { %1661 = vmatmul.mubr.msk.f32.vlgmr.msra.gmra.mrb[0].mxu1 %vm448_vm1, %v1949_v8 }
  0x12   : > { %1665 = vmatprep.mubr.msk.f32.mxu1 %vm1828_vm0, %v1829_v6 }
  0xe4   : > { %v518_v10 = vpop.f32.mrb[0].mxu1 }
  0xe5   : > { %v1959_v11 = vadd.f32 %v1586_v9, %v518_v10  ;;  %v1662_v12 = vpop.f32.mrb[1].mxu1 }
  0xe7   : > { %689 = vrot.lane.b32.xlu1 %v1959_v11, %s1830_s24  ;;  %523 = vrot.lane.b32.xlu0 %v1959_v11, %s1831_s27 }
  0xeb   : > { %863 = vrot.lane.b32.xlu1 %v1959_v11, %s1832_s28  ;;  %691 = vrot.lane.b32.xlu0 %v1959_v11, %s1833_s29 }
  0xef   : > { %1035 = vrot.lane.b32.xlu1 %v1959_v11, %s1834_s30  ;;  %861 = vrot.lane.b32.xlu0 %v1959_v11, %s1835_s14 }
  0xf3   : > { %1033 = vrot.lane.b32.xlu0 %v1959_v11, %s1836_s15  ;;  %s1842_s15 = smov 16  }
 0x159   : > { %v690_v13 = vpop.permute.xlu1 %689  ;;  %v524_v14 = vpop.permute.xlu0 %523 }
 0x15a   : > { %1664 = vmatpush3.xpose.msk.msra.mxu1 %vm525_vm2, %v524_v14 }
 0x15b   : > { %1668 = vmatprep.subr.mxu1 %v1829_v6 }
 0x15d   : > { %1666 = vmatmul.mubr.msk.f32.vlgmr.msra.gmra.mrb[2].mxu1 %vm525_vm2, %v1959_v11  ;;  %v692_v15 = vpop.permute.xlu0 %691  ;;  %v864_v16 = vpop.permute.xlu1 %863 }
 0x15e   : > { %1674 = vmatpush3.xpose.msk.msra.mxu0 %vm525_vm2, %v692_v15  ;;  %1670 = vmatprep.mubr.msk.f32.mxu1 %vm1828_vm0, %v1829_v6  ;;  %v1206_v15 = vld [vmem:[%s2114_s3] sm:$0xff] }
 0x15f   : > { %1683 = vmatprep.subr.mxu0 %v1829_v6 }
 0x161   : > { %1676 = vmatmul.mubr.msk.f32.vlgmr.msra.gmra.mrb[0].mxu0 %vm525_vm2, %v690_v13  ;;  %v862_v17 = vpop.permute.xlu0 %861  ;;  %v1036_v18 = vpop.permute.xlu1 %1035 }
 0x162   : > { %1684 = vmatpush3.xpose.msk.msra.mxu0 %vm525_vm2, %v864_v16  ;;  %1685 = vmatprep.mubr.msk.f32.mxu0 %vm1828_vm0, %v1829_v6  ;;  %v1207_v16 = vld [vmem:[%s2114_s3 + $0x8] sm:$0xff] }
 0x163   : > { %1693 = vmatprep.subr.mxu0 %v1829_v6 }
 0x165   : > { %1686 = vmatmul.mubr.msk.f32.vlgmr.msra.gmra.mrb[2].mxu0 %vm525_vm2, %v862_v17  ;;  %v1034_v19 = vpop.permute.xlu0 %1033  ;;  %v1751_v17 = vpack.c.bf16 %v1207_v16, %v1206_v15 }
 0x166   : > { %1694 = vmatpush3.xpose.msk.msra.mxu0 %vm525_vm2, %v1036_v18  ;;  %1695 = vmatprep.mubr.msk.f32.mxu0 %vm1828_vm0, %v1829_v6  ;;  %v1208_v18 = vld [vmem:[%s2114_s3 + $0x10] sm:$0xff] }
 0x167   : > { %1750 = vmatprep.subr.bf16.mxu0 %v1827_v3 }
 0x169   : > { %1696 = vmatmul.mubr.msk.f32.vlgmr.msra.gmra.mrb[4].mxu0 %vm525_vm2, %v1034_v19  ;;  %v1209_v19 = vld [vmem:[%s2114_s3 + $0x18] sm:$0xff] }
 0x16a   : > { %1711 = vmatprep.mubr.msk.f32.mxu0 %vm1828_vm0, %v1829_v6  ;;  %1752 = vmatpush3.bf16.msra.mxu0 %v1751_v17 }
 0x16b   : > { %1753 = vmatprep.subr.bf16.mxu0 %v1827_v3 }
 0x230   : > { %v596_v20 = vpop.f32.mrb[2].mxu1 }
 0x231   : > { %v600_v21 = vmul.f32 0.35355338, %v596_v20  ;;  %v1667_v22 = vpop.f32.mrb[3].mxu1  ;;  %v1754_v20 = vpack.c.bf16 %v1209_v19, %v1208_v18 }
 0x233   : > { %v601_v23 = vsel %vm525_vm2, %v600_v21, -inf  ;;  %1755 = vmatpush3.bf16.msra.mxu0 %v1754_v20 }
 0x234   : > { %v763_v24 = vpop.f32.mrb[0].mxu0  ;;  %602 = vmax.xlane.f32.xlu1 %v601_v23  ;;  %1762 = vmatprep.subr.bf16.mxu0 %v1827_v3 }
 0x235   : > { %v767_v25 = vmul.f32 0.35355338, %v763_v24  ;;  %v1677_v26 = vpop.f32.mrb[1].mxu0 }
 0x237   : > { %v768_v27 = vsel %vm525_vm2, %v767_v25, -inf }
 0x238   : > { %769 = vmax.xlane.f32.xlu0 %v768_v27  ;;  %v935_v28 = vpop.f32.mrb[2].mxu0 }
 0x239   : > { %v939_v29 = vmul.f32 0.35355338, %v935_v28  ;;  %v1687_v30 = vpop.f32.mrb[3].mxu0 }
 0x23b   : > { %v940_v31 = vsel %vm525_vm2, %v939_v29, -inf }
 0x23c   : > { %941 = vmax.xlane.f32.xlu0 %v940_v31  ;;  %v1107_v32 = vpop.f32.mrb[4].mxu0 }
 0x23d   : > { %v1111_v33 = vmul.f32 0.35355338, %v1107_v32  ;;  %v1697_v34 = vpop.f32.mrb[5].mxu0 }
 0x23f   : > { %v1112_v35 = vsel %vm525_vm2, %v1111_v33, -inf }
 0x240   : > { %1113 = vmax.xlane.f32.xlu1 %v1112_v35 }
 0x251   : > { %779 = vrot.lane.b32.xlu1 %v1959_v11, %s1837_s16  ;;  %s1843_s16 = smov 24  }
 0x2c1   : > { %v603_v36 = vpop.xlane.xlu1 %602 }
 0x2c2   : > { %v604_v37 = vsub.f32 %v600_v21, %v603_v36 }
 0x2c4   : > { %v605_v38 = vmul.f32 1.442695, %v604_v37 }
 0x2c5   : > { %v770_v39 = vpop.xlane.xlu0 %769 }
 0x2c6   : > { %1799 = vpow2.f32 %v605_v38  ;;  %v771_v40 = vsub.f32 %v767_v25, %v770_v39 }
 0x2c8   : > { %v772_v41 = vmul.f32 1.442695, %v771_v40  ;;  %v1322_v40 = vld [vmem:[%s2118_s7 + $0x8] sm:$0xff] }
 0x2c9   : > { %v942_v51 = vpop.xlane.xlu0 %941 }
 0x2ca   : > { %1801 = vpow2.f32 %v772_v41  ;;  %v943_v52 = vsub.f32 %v939_v29, %v942_v51  ;;  %v1600_v29 = vld [vmem:[%s2115_s4] ss:$0 sm:$0xff]  ;;  %v1411_v51 = vld [vmem:[%s2120_s9 + $0x28] sm:$0xff] }
 0x2cc   : > { %v944_v53 = vmul.f32 1.442695, %v943_v52 }
 0x2cd   : > { %v1114_v42 = vpop.xlane.xlu1 %1113 }
 0x2ce   : > { %v1115_v43 = vsub.f32 %v1111_v33, %v1114_v42  ;;  %v1324_v42 = vld [vmem:[%s2118_s7 + $0x18] sm:$0xff] }
 0x2d0   : > { %v1800_v44 = vpop.eup %1799  ;;  %v1116_v45 = vmul.f32 1.442695, %v1115_v43 }
 0x2d1   : > { %v607_v46 = vsel %vm525_vm2, %v1800_v44, 0.0  ;;  %v780_v56 = vpop.permute.xlu1 %779 }
 0x2d2   : > { %1803 = vpow2.f32 %v1116_v45  ;;  %608 = vadd.xlane.f32.xlu0 %v607_v46  ;;  %v1407_v45 = vld [vmem:[%s2120_s9 + $0x8] sm:$0xff]  ;;  %v1408_v46 = vld [vmem:[%s2120_s9 + $0x10] sm:$0xff] }
 0x2d3   : > { %1805 = vpow2.f32 %v944_v53 }
 0x2d4   : > { %v1802_v47 = vpop.eup %1801 }
 0x2d5   : > { %v774_v48 = vsel %vm525_vm2, %v1802_v47, 0.0 }
 0x2d6   : > { %775 = vadd.xlane.f32.xlu1 %v774_v48  ;;  %v1409_v48 = vld [vmem:[%s2120_s9 + $0x18] sm:$0xff] }
 0x2dc   : > { %v1804_v49 = vpop.eup %1803 }
 0x2dd   : > { %v1118_v50 = vsel %vm525_vm2, %v1804_v49, 0.0  ;;  %v1806_v54 = vpop.eup %1805 }
 0x2de   : > { %1119 = vadd.xlane.f32.xlu1 %v1118_v50  ;;  %v946_v55 = vsel %vm525_vm2, %v1806_v54, 0.0  ;;  %v1410_v50 = vld [vmem:[%s2120_s9 + $0x20] sm:$0xff] }
 0x2df   : > { %v1769_v52 = vpack.c.bf16 %v1411_v51, %v1410_v50 }
 0x2e8   : > { %612 = vrot.lane.b32.xlu0 %v1959_v11, %s1838_s17 }
 0x2ef   : > { %951 = vrot.lane.b32.xlu1 %v1959_v11, %s1839_s19 }
 0x307   : > { %947 = vadd.xlane.f32.xlu0 %v946_v55 }
 0x31d   : > { %1123 = vrot.lane.b32.xlu0 %v1959_v11, %s1840_s20 }
 0x35f   : > { %v609_v57 = vpop.xlane.xlu0 %608 }
 0x360   : > { %1807 = vrcp.f32 %v609_v57  ;;  %v1602_v57 = vld [vmem:[%s2116_s5] ss:$0 sm:$0xff] }
 0x363   : > { %v613_v58 = vpop.permute.xlu0 %612  ;;  %v776_v59 = vpop.xlane.xlu1 %775 }
 0x364   : > { %1809 = vrcp.f32 %v776_v59  ;;  %1669 = vmatpush3.msra.mxu1 %v613_v58  ;;  %v1603_v59 = vld [vmem:[%s2117_s6] ss:$0 sm:$0xff] }
 0x365   : > { %1678 = vmatprep.subr.mxu1 %v1829_v6 }
 0x36a   : > { %v1808_v60 = vpop.eup %1807 }
 0x36b   : > { %v611_v61 = vmul.f32 %v1808_v60, %v1800_v44  ;;  %v1120_v62 = vpop.xlane.xlu1 %1119  ;;  %v1406_v44 = vld [vmem:[%s2120_s9] sm:$0xff] }
 0x36d   : > { %1671 = vmatmul.mubr.msk.f32.vlgmr.msra.gmra.mrb[4].mxu1 %vm525_vm2, %v611_v61 }
 0x36e   : > { %v1810_v63 = vpop.eup %1809  ;;  %1679 = vmatpush3.msra.mxu1 %v780_v56  ;;  %1680 = vmatprep.mubr.msk.f32.mxu1 %vm1828_vm0, %v1829_v6 }
 0x36f   : > { %v778_v0 = vmul.f32 %v1810_v63, %v1802_v47  ;;  %v952_v1 = vpop.permute.xlu1 %951  ;;  %1688 = vmatprep.subr.mxu1 %v1829_v6  ;;  %v1763_v47 = vpack.c.bf16 %v1407_v45, %v1406_v44 }
 0x371   : > { %1681 = vmatmul.mubr.msk.f32.vlgmr.msra.gmra.mrb[6].mxu1 %vm525_vm2, %v778_v0  ;;  %v1604_v0 = vld [vmem:[%s2119_s8] ss:$0 sm:$0xff] }
 0x372   : > { %1689 = vmatpush3.msra.mxu1 %v952_v1  ;;  %1690 = vmatprep.mubr.msk.f32.mxu1 %vm1828_vm0, %v1829_v6 }
 0x373   : > { %1698 = vmatprep.subr.mxu1 %v1829_v6 }
 0x394   : > { %v948_v2 = vpop.xlane.xlu0 %947 }
 0x395   : > { %1811 = vrcp.f32 %v948_v2 }
 0x396   : > { %1813 = vrcp.f32 %v1120_v62  ;;  %v1413_v62 = vld [vmem:[%s2120_s9 + $0x38] sm:$0xff] }
 0x398   : > { %v1124_v9 = vpop.permute.xlu0 %1123 }
 0x39f   : > { %v1812_v4 = vpop.eup %1811 }
 0x3a0   : > { %v950_v5 = vmul.f32 %v1812_v4, %v1806_v54  ;;  %v1814_v7 = vpop.eup %1813 }
 0x3a1   : > { %v1122_v10 = vmul.f32 %v1814_v7, %v1804_v49  ;;  %v1766_v49 = vpack.c.bf16 %v1409_v48, %v1408_v46  ;;  %v1606_v7 = vld [vmem:[%s2121_s10] ss:$0 sm:$0xff] }
 0x3a2   : > { %1691 = vmatmul.mubr.msk.f32.vlgmr.msra.gmra.mrb[8].mxu1 %vm525_vm2, %v950_v5 }
 0x3a3   : > { %1699 = vmatpush3.msra.mxu1 %v1124_v9  ;;  %1700 = vmatprep.mubr.msk.f32.mxu1 %vm1828_vm0, %v1829_v6 }
 0x3a4   : > { %1756 = vmatprep.subr.bf16.mxu1 %v1827_v3 }
 0x3a6   : > { %1701 = vmatmul.mubr.msk.f32.vlgmr.msra.gmra.mrb[10].mxu1 %vm525_vm2, %v1122_v10 }
 0x3a7   : > { %1722 = vmatprep.mubr.msk.f32.mxu1 %vm1828_vm0, %v1829_v6 }
 0x440   : > { %v684_v11 = vpop.f32.mrb[4].mxu1 }
 0x441   : > { %688 = vst.msk [vmem:[#allocation2] sm:$0xff] %vm525_vm2, %v684_v11  ;;  %v1672_v12 = vpop.f32.mrb[5].mxu1 }
 0x444   : > { %v851_v13 = vpop.f32.mrb[6].mxu1 }
 0x445   : > { %856 = vrot.lane.b32.xlu1 %v851_v13, %s1841_s21  ;;  %v1682_v14 = vpop.f32.mrb[7].mxu1 }
 0x475   : > { %v1023_v21 = vpop.f32.mrb[8].mxu1 }
 0x476   : > { %1028 = vrot.lane.b32.xlu0 %v1023_v21, %s1842_s15  ;;  %v1692_v22 = vpop.f32.mrb[9].mxu1  ;;  %s435_s15 = scalar_lea.vmem %s2124_s13, %s1584_s18 }
 0x479   : > { %v1195_v23 = vpop.f32.mrb[10].mxu1 }
 0x47a   : > { %1200 = vrot.lane.b32.xlu1 %v1195_v23, %s1843_s16  ;;  %v1702_v24 = vpop.f32.mrb[11].mxu1  ;;  %v1608_v23 = vld [vmem:[%s2122_s11] ss:$0 sm:$0xff] }
 0x4b7   : > { %v857_v25 = vpop.permute.xlu1 %856 }
 0x4b8   : > { %860 = vst.msk [vmem:[#allocation2] sm:$0xff] %vm859_vm3, %v857_v25  ;;  %v1609_v25 = vld [vmem:[%s2123_s12] ss:$0 sm:$0xff] }
 0x4e8   : > { %v1029_v26 = vpop.permute.xlu0 %1028 }
 0x4e9   : > { %1032 = vst.msk [vmem:[#allocation2] sm:$0xff] %vm1031_vm4, %v1029_v26 }
 0x4ec   : > { %v1201_v27 = vpop.permute.xlu1 %1200 }
 0x4ed   : > { %1204 = vst.msk [vmem:[#allocation2] sm:$0xff] %vm1203_vm5, %v1201_v27 }
 0x4f4   : > { %v1205_v28 = vld [vmem:[#allocation2] sm:$0xff] }
 0x4f5   : > { %1712 = vmatmul.mubr.msk.f32.vlgmr.msra.gmra.mrb[6].mxu0 %vm448_vm1, %v1205_v28 }
 0x4f6   : > { %1741 = vmatprep.mubr.msk.f32.mxu0 %vm1828_vm0, %v1829_v6  ;;  %v1321_v6 = vld [vmem:[%s2118_s7] sm:$0xff]  ;;  %1764 = vmatpush3.bf16.msra.mxu0 %v1763_v47 }
 0x4f7   : > { %v1757_v41 = vpack.c.bf16 %v1322_v40, %v1321_v6  ;;  %1765 = vmatprep.subr.bf16.mxu0 %v1827_v3 }
 0x4f9   : > { %1758 = vmatpush3.bf16.msra.mxu1 %v1757_v41 }
 0x4fa   : > { %1759 = vmatprep.subr.bf16.mxu1 %v1827_v3  ;;  %1767 = vmatpush3.bf16.msra.mxu0 %v1766_v49 }
 0x4fb   : > { %1768 = vmatprep.subr.bf16.mxu0 %v1827_v3 }
 0x4fe   : > { %1770 = vmatpush3.bf16.msra.mxu0 %v1769_v52 }
 0x4ff   : > { %1771 = vmatprep.subr.bf16.mxu0 %v1827_v3  ;;  %v1412_v3 = vld [vmem:[%s2120_s9 + $0x30] sm:$0xff] }
 0x500   : > { %v1772_v63 = vpack.c.bf16 %v1413_v62, %v1412_v3 }
 0x502   : > { %1773 = vmatpush3.bf16.msra.mxu0 %v1772_v63 }
 0x5c8   : > { %v1286_v30 = vpop.f32.mrb[6].mxu0 }
 0x5c9   : > { %v1287_v31 = vadd.f32 %v1600_v29, %v1286_v30  ;;  %v1713_v32 = vpop.f32.mrb[7].mxu0 }
 0x5cb   : > { %v1290_v33 = vadd.f32 %v1287_v31, %v1949_v8  ;;  %v1323_v8 = vld [vmem:[%s2118_s7 + $0x10] sm:$0xff] }
 0x5cc   : > { %v1760_v43 = vpack.c.bf16 %v1324_v42, %v1323_v8 }
 0x5cd   : > { %v1291_v34 = vsel %vm448_vm1, %v1290_v33, 0.0 }
 0x5ce   : > { %1292 = vadd.xlane.f32.xlu0 %v1291_v34  ;;  %1761 = vmatpush3.bf16.msra.mxu1 %v1760_v43 }
 0x65b   : > { %v1293_v35 = vpop.xlane.xlu0 %1292 }
 0x65c   : > { %v1295_v36 = vmul.f32 0.03125, %v1293_v35 }
 0x65e   : > { %v1296_v37 = vsub.f32 %v1290_v33, %v1295_v36 }
 0x660   : > { %v1297_v38 = vmul.f32 %v1296_v37, %v1296_v37 }
 0x662   : > { %v1298_v39 = vsel %vm448_vm1, %v1297_v38, 0.0 }
 0x663   : > { %1299 = vadd.xlane.f32.xlu1 %v1298_v39 }
 0x6f0   : > { %v1300_v53 = vpop.xlane.xlu1 %1299 }
 0x6f1   : > { %v1301_v54 = vmul.f32 0.03125, %v1300_v53 }
 0x6f3   : > { %v1302_v55 = vadd.f32 1e-05, %v1301_v54 }
 0x6f5   : > { %1815 = vrsqrt.f32 %v1302_v55 }
 0x6ff   : > { %v1816_v56 = vpop.eup %1815 }
 0x700   : > { %v1304_v58 = vmul.f32 %v1816_v56, %v1296_v37 }
 0x702   : > { %v1312_v60 = vmul.f32 %v1602_v57, %v1304_v58 }
 0x704   : > { %v1320_v61 = vadd.f32 %v1603_v59, %v1312_v60 }
 0x706   : > { %1723 = vmatmul.mubr.msk.f32.vlgmr.msra.gmra.mrb[12].mxu1 %vm448_vm1, %v1320_v61 }
 0x7d9   : > { %v1401_v1 = vpop.f32.mrb[12].mxu1 }
 0x7da   : > { %v1402_v2 = vadd.f32 %v1604_v0, %v1401_v1  ;;  %v1724_v4 = vpop.f32.mrb[13].mxu1 }
 0x7dc   : > { %v1405_v5 = vmax.f32 %v1402_v2, 0.0 }
 0x7de   : > { %1742 = vmatmul.mubr.msk.f32.vlgmr.msra.gmra.mrb[8].mxu0 %vm1421_vm6, %v1405_v5 }
 0x8b1   : > { %v1491_v9 = vpop.f32.mrb[8].mxu0 }
 0x8b2   : > { %v1492_v10 = vadd.f32 %v1606_v7, %v1491_v9  ;;  %v1743_v11 = vpop.f32.mrb[9].mxu0 }
 0x8b4   : > { %v1495_v12 = vadd.f32 %v1492_v10, %v1320_v61 }
 0x8b6   : > { %v1496_v13 = vsel %vm448_vm1, %v1495_v12, 0.0 }
 0x8b7   : > { %1497 = vadd.xlane.f32.xlu0 %v1496_v13 }
 0x944   : > { %v1498_v14 = vpop.xlane.xlu0 %1497 }
 0x945   : > { %v1499_v15 = vmul.f32 0.03125, %v1498_v14 }
 0x947   : > { %v1500_v16 = vsub.f32 %v1495_v12, %v1499_v15 }
 0x949   : > { %v1501_v17 = vmul.f32 %v1500_v16, %v1500_v16 }
 0x94b   : > { %v1502_v18 = vsel %vm448_vm1, %v1501_v17, 0.0 }
 0x94c   : > { %1503 = vadd.xlane.f32.xlu0 %v1502_v18 }
 0x9d9   : > { %v1504_v19 = vpop.xlane.xlu0 %1503 }
 0x9da   : > { %v1505_v20 = vmul.f32 0.03125, %v1504_v19 }
 0x9dc   : > { %v1506_v21 = vadd.f32 1e-05, %v1505_v20 }
 0x9de   : > { %1817 = vrsqrt.f32 %v1506_v21 }
 0x9e8   : > { %v1818_v22 = vpop.eup %1817 }
 0x9e9   : > { %v1508_v24 = vmul.f32 %v1818_v22, %v1500_v16 }
 0x9eb   : > { %v1516_v26 = vmul.f32 %v1608_v23, %v1508_v24 }
 0x9ed   : > { %v1524_v27 = vadd.f32 %v1609_v25, %v1516_v26 }
 0x9ef   : > { %1525 = vst.msk [vmem:[%s435_s15] sm:$0xff] %vm448_vm1, %v1524_v27 }
 0x9f0 PF: > { %s23_s25 = sadd.s32 1, %s1825_s25  }
 0x9f1   : > { %p20_p4 = scmp.ge.s32.totalorder %s23_s25, 4  }
 0x9f3   :  { %22 = sbr.rel (!%p20_p4) target bundleno = 1 (0x1), region = 102 }

</bundles_post_ra>
